<compile_context>
chip_gen: v7x
topology: tpu7x:2x2x1
jax: 0.10.0
libtpu: 0.0.40
codegen_flags: <defaults>
</compile_context>

<pallas_src>
import functools
import math

import jax
import jax.numpy as jnp
from jax.experimental import pallas as pl
from jax.experimental.pallas import tpu as pltpu


def _vmem_limit_bytes():
    """Scoped-VMEM budget derived from the chip (v7x: ~54 MiB, v5e/v6e: ~108 MiB)."""
    default = 48 * 1024 * 1024
    try:
        cap = getattr(pltpu.get_tpu_info(), "vmem_capacity_bytes", None)
        if not cap:
            return default
        return int(min(int(cap * 0.85), 110 * 1024 * 1024))
    except Exception:
        return default


_VMEM_LIMIT = _vmem_limit_bytes()


# ----------------------------- helpers (in-kernel) --------------------------

def _layernorm(x, w, b, eps=1e-5):
    # f32 statistics (matches PyTorch nn.LayerNorm eval semantics).
    mean = jnp.mean(x, axis=-1, keepdims=True)
    var = jnp.mean((x - mean) ** 2, axis=-1, keepdims=True)
    return (x - mean) * jax.lax.rsqrt(var + eps) * w + b


def _bf16(x):
    return x.astype(jnp.bfloat16)


# ----------------------------- Pallas kernels -------------------------------

def _embed_kernel(p_ref, w_ref, b_ref, cls_ref, pos_ref, o_ref):
    # p_ref: (Bt, S, C*p*p) bf16 (row 0 of each image is a dummy zero row so
    # the big token store is sublane-aligned).  w_ref: (C*p*p, D) bf16.
    # b_ref/cls_ref: (1, D) f32.  pos_ref: (S, D) f32.  o_ref: (Bt, S, D) f32.
    Bt, S, Cpp = p_ref.shape
    D = w_ref.shape[1]
    flat = p_ref[...].reshape(Bt * S, Cpp)
    pe = jnp.dot(flat, w_ref[...],
                 preferred_element_type=jnp.float32) + b_ref[...]
    # Aligned full-block store (dummy row 0 will be overwritten below).
    o_ref[...] = pe.reshape(Bt, S, D) + pos_ref[...]
    cls_row = cls_ref[...] + pos_ref[:1, :]                    # (1, D)
    for bi in range(Bt):
        o_ref[bi, :1, :] = cls_row


def _encoder_stack_kernel(num_heads,
                          x_ref,
                          ln1w, ln1b, qkvw, qkvb, projw, projb,
                          ln2w, ln2b, fc1w, fc1b, fc2w, fc2b,
                          o_ref, tok_ref, attn_ref):
    # Grid = (batch_tiles, depth).  x_ref/o_ref block: (Bt, S, D) f32, indexed
    # only by the batch axis (tokens stay resident in VMEM across depth).
    # Weight refs: (1, ...) blocks of layer-stacked tensors, indexed by depth.
    # tok_ref: (Bt*S, D) f32 resident tokens.  attn_ref: (Bt*S, D) bf16.
    l = pl.program_id(1)
    Bt, S, D = x_ref.shape
    hd = D // num_heads

    @pl.when(l == 0)
    def _():
        tok_ref[...] = x_ref[...].reshape(Bt * S, D)

    x = tok_ref[...]                                           # (Bt*S, D) f32

    # ---------------- Multi-head self-attention (pre-norm) -----------------
    h = _layernorm(x, ln1w[0], ln1b[0])
    # 1/sqrt(hd) scale is already folded into the Q columns of qkvw / qkvb.
    qkv = jnp.dot(_bf16(h), qkvw[0],
                  preferred_element_type=jnp.float32) + qkvb[0]  # (Bt*S, 3D)

    for bi in range(Bt):
        r0 = bi * S
        heads = []
        for hi in range(num_heads):
            lo = hi * hd
            qh = _bf16(qkv[r0:r0 + S, lo:lo + hd])
            kh = _bf16(qkv[r0:r0 + S, D + lo:D + lo + hd])
            vh = _bf16(qkv[r0:r0 + S, 2 * D + lo:2 * D + lo + hd])
            # q @ k^T without materializing the transpose (contract dim 1).
            scores = jax.lax.dot_general(
                qh, kh, (((1,), (1,)), ((), ())),
                preferred_element_type=jnp.float32)              # (S, S) f32
            scores = scores - jnp.max(scores, axis=-1, keepdims=True)
            p = jnp.exp(scores)
            p = p * pl.reciprocal(jnp.sum(p, axis=-1, keepdims=True),
                                  approx=True)
            heads.append(jnp.dot(_bf16(p), vh,
                                 preferred_element_type=jnp.float32))
        # One full-lane-width bf16 store per image (no per-head masked stores).
        attn_ref[r0:r0 + S, :] = _bf16(jnp.concatenate(heads, axis=-1))

    # Single full-K output projection over all Bt*S rows.
    x = x + jnp.dot(attn_ref[...], projw[0],
                    preferred_element_type=jnp.float32) + projb[0]

    # ------------------------------ MLP (pre-norm) --------------------------
    h = _layernorm(x, ln2w[0], ln2b[0])
    h = jnp.dot(_bf16(h), fc1w[0],
                preferred_element_type=jnp.float32) + fc1b[0]
    h = jax.nn.gelu(h, approximate=False)            # PyTorch nn.GELU() = erf
    h = jnp.dot(_bf16(h), fc2w[0],
                preferred_element_type=jnp.float32) + fc2b[0]
    y = x + h

    tok_ref[...] = y                                  # stays resident in VMEM

    @pl.when(l == pl.num_programs(1) - 1)
    def _():
        o_ref[...] = y.reshape(Bt, S, D)


def _head_kernel(cls_ref, lnw, lnb, hw, hb, o_ref):
    # cls_ref: (B, D) f32   hw: (D, Cout) bf16   ->  o_ref: (B, Cout) f32
    h = _layernorm(cls_ref[...], lnw[...], lnb[...])
    o_ref[...] = (
        jnp.dot(_bf16(h), hw[...], preferred_element_type=jnp.float32)
        + hb[...]
    )


# ------------------------------ JAX wrappers --------------------------------

def _const_spec(shape):
    """BlockSpec for a grid-invariant (weight) input: single-buffered."""
    nd = len(shape)
    return pl.BlockSpec(shape, lambda b, _nd=nd: (0,) * _nd,
                        pipeline_mode=pl.Buffered(1))


def _pick_bt(batch):
    """Images per grid step (divisor of batch)."""
    for cand in (4, 2, 1):
        if batch % cand == 0:
            return cand
    return 1


def embed_tokens(x, fast, patch_size, embed_dim, bt):
    """Conv2d(k=p, s=p) patch embedding fused with cls prepend + pos add."""
    B, C, H, W = x.shape
    p = patch_size
    nh, nw = H // p, W // p
    N = nh * nw
    S = N + 1
    Cpp = C * p * p
    # NCHW -> (B, nh, nw, C, p, p) -> (B, N, C*p*p); flattening order (c,ph,pw)
    # matches PyTorch Conv2d weight.reshape(D, C*p*p).
    patches = (
        x.reshape(B, C, nh, p, nw, p)
        .transpose(0, 2, 4, 1, 3, 5)
        .reshape(B, N, Cpp)
    )
    # Dummy zero row per image -> the (S, D) token store in-kernel is aligned.
    patches = jnp.concatenate(
        [jnp.zeros((B, 1, Cpp), patches.dtype), patches], axis=1)
    # bf16 input DMA; the only consumer is a bf16 MXU matmul.
    patches = patches.astype(jnp.bfloat16)

    return pl.pallas_call(
        _embed_kernel,
        out_shape=jax.ShapeDtypeStruct((B, S, embed_dim), jnp.float32),
        grid=(B // bt,),
        in_specs=[
            pl.BlockSpec((bt, S, Cpp), lambda b: (b, 0, 0)),
            _const_spec((Cpp, embed_dim)),
            _const_spec((1, embed_dim)),
            _const_spec((1, embed_dim)),
            _const_spec((S, embed_dim)),
        ],
        out_specs=pl.BlockSpec((bt, S, embed_dim), lambda b: (b, 0, 0)),
        compiler_params=pltpu.CompilerParams(
            dimension_semantics=("parallel",),
            vmem_limit_bytes=_VMEM_LIMIT),
    )(patches, fast["patch_w"], fast["patch_b"], fast["cls"], fast["pos"])


_W_ORDER = ("ln1_w", "ln1_b", "qkv_w", "qkv_b", "proj_w", "proj_b",
            "ln2_w", "ln2_b", "fc1_w", "fc1_b", "fc2_w", "fc2_b")


def encoder_stack(x, fast, num_heads, bt):
    """All encoder blocks in one pallas_call, grid=(batch_tiles, depth)."""
    B, S, D = x.shape
    L = fast["qkv_w"].shape[0]

    act_map = lambda b, l: (b, 0, 0)      # tokens resident across depth axis
    w_map = lambda b, l: (l, 0, 0)        # layer weights indexed by depth

    weights = [fast[k] for k in _W_ORDER]
    # Default Buffered(2) pipelining -> next layer's weight DMA overlaps with
    # the current layer's compute.
    w_specs = [pl.BlockSpec((1,) + w.shape[1:], w_map) for w in weights]

    return pl.pallas_call(
        functools.partial(_encoder_stack_kernel, num_heads),
        out_shape=jax.ShapeDtypeStruct((B, S, D), jnp.float32),
        grid=(B // bt, L),
        in_specs=[pl.BlockSpec((bt, S, D), act_map)] + w_specs,
        out_specs=pl.BlockSpec((bt, S, D), act_map),
        scratch_shapes=[pltpu.VMEM((bt * S, D), jnp.float32),
                        pltpu.VMEM((bt * S, D), jnp.bfloat16)],
        compiler_params=pltpu.CompilerParams(
            dimension_semantics=("parallel", "arbitrary"),
            vmem_limit_bytes=_VMEM_LIMIT),
    )(x, *weights)


def classifier_head(cls_tokens, norm_w, norm_b, head_w, head_b):
    B, D = cls_tokens.shape
    Cout = head_w.shape[1]
    return pl.pallas_call(
        _head_kernel,
        out_shape=jax.ShapeDtypeStruct((B, Cout), jnp.float32),
        compiler_params=pltpu.CompilerParams(
            vmem_limit_bytes=_VMEM_LIMIT),
    )(cls_tokens, norm_w, norm_b, head_w, head_b)


def vit_forward(x, fast, cfg):
    B = x.shape[0]
    D = cfg["embed_dim"]
    bt = _pick_bt(B)
    tokens = embed_tokens(x, fast, cfg["patch_size"], D, bt)      # (B, S, D)
    tokens = encoder_stack(tokens, fast, cfg["num_heads"], bt)    # (B, S, D)
    cls_out = tokens[:, 0]                                        # (B, D)
    logits = classifier_head(cls_out, fast["norm_w"], fast["norm_b"],
                             fast["head_w"], fast["head_b"])
    if cfg["num_outputs"] > 1:
        logits = logits.reshape(B, cfg["num_outputs"], cfg["num_classes"])
    return logits


# --------------------------- Parameter handling -----------------------------

def _xavier_uniform(key, fan_in, fan_out):
    limit = math.sqrt(6.0 / (fan_in + fan_out))
    return jax.random.uniform(key, (fan_in, fan_out), jnp.float32,
                              minval=-limit, maxval=limit)


def _trunc_normal(key, shape, std=0.02):
    return std * jax.random.truncated_normal(key, -2.0, 2.0, shape, jnp.float32)


def init_params(key, cfg):
    """f32 parameters matching the PyTorch module's initialization."""
    D = cfg["embed_dim"]
    p = cfg["patch_size"]
    C = cfg["in_channels"]
    N = (cfg["img_size"] // p) ** 2
    S = N + 1
    H = int(D * cfg["mlp_ratio"])
    Cout = cfg["num_classes"] * cfg["num_outputs"]

    keys = iter(jax.random.split(key, 8 + 8 * cfg["depth"]))
    params = {
        "patch_w": _xavier_uniform(next(keys), C * p * p, D),
        "patch_b": jnp.zeros((1, D), jnp.float32),
        "cls_token": _trunc_normal(next(keys), (1, 1, D)),
        "pos_embed": _trunc_normal(next(keys), (1, S, D)),
        "norm_w": jnp.ones((1, D), jnp.float32),
        "norm_b": jnp.zeros((1, D), jnp.float32),
        "head_w": _xavier_uniform(next(keys), D, Cout),
        "head_b": jnp.zeros((1, Cout), jnp.float32),
        "blocks": [],
    }
    for _ in range(cfg["depth"]):
        params["blocks"].append({
            "ln1_w": jnp.ones((1, D), jnp.float32),
            "ln1_b": jnp.zeros((1, D), jnp.float32),
            "qkv_w": _xavier_uniform(next(keys), D, 3 * D),
            "qkv_b": jnp.zeros((1, 3 * D), jnp.float32),
            "proj_w": _xavier_uniform(next(keys), D, D),
            "proj_b": jnp.zeros((1, D), jnp.float32),
            "ln2_w": jnp.ones((1, D), jnp.float32),
            "ln2_b": jnp.zeros((1, D), jnp.float32),
            "fc1_w": _xavier_uniform(next(keys), D, H),
            "fc1_b": jnp.zeros((1, H), jnp.float32),
            "fc2_w": _xavier_uniform(next(keys), H, D),
            "fc2_b": jnp.zeros((1, D), jnp.float32),
        })
    return params


def prepare_params(params, cfg):
    """One-time conversion: bf16 matmul weights, layer-stacked tensors, and the
    attention scale folded into the Q columns of qkv_w / qkv_b."""
    D = cfg["embed_dim"]
    hd = D // cfg["num_heads"]
    scale = 1.0 / math.sqrt(hd)
    S = params["pos_embed"].shape[1]

    def stack(name):
        return jnp.stack([blk[name] for blk in params["blocks"]], axis=0)

    q_scale = jnp.concatenate(
        [jnp.full((1, D), scale, jnp.float32),
         jnp.ones((1, 2 * D), jnp.float32)], axis=-1)           # (1, 3D)
    qkv_w = stack("qkv_w") * q_scale                            # (L, D, 3D)
    qkv_b = stack("qkv_b") * q_scale                            # (L, 1, 3D)

    return {
        "patch_w": params["patch_w"].astype(jnp.bfloat16),
        "patch_b": params["patch_b"],
        "cls": params["cls_token"].reshape(1, D),
        "pos": params["pos_embed"].reshape(S, D),
        "ln1_w": stack("ln1_w"), "ln1_b": stack("ln1_b"),
        "qkv_w": qkv_w.astype(jnp.bfloat16), "qkv_b": qkv_b,
        "proj_w": stack("proj_w").astype(jnp.bfloat16),
        "proj_b": stack("proj_b"),
        "ln2_w": stack("ln2_w"), "ln2_b": stack("ln2_b"),
        "fc1_w": stack("fc1_w").astype(jnp.bfloat16), "fc1_b": stack("fc1_b"),
        "fc2_w": stack("fc2_w").astype(jnp.bfloat16), "fc2_b": stack("fc2_b"),
        "norm_w": params["norm_w"], "norm_b": params["norm_b"],
        "head_w": params["head_w"].astype(jnp.bfloat16),
        "head_b": params["head_b"],
    }


# --------------------------------- Driver -----------------------------------

if __name__ == "__main__":
    cfg = dict(
        img_size=16, patch_size=4, in_channels=4,
        num_classes=10, embed_dim=32, depth=2, num_heads=4,
        mlp_ratio=2.0, dropout=0.1, num_outputs=1,
    )
    key = jax.random.PRNGKey(0)
    pkey, xkey = jax.random.split(key)
    params = init_params(pkey, cfg)
    fast = prepare_params(params, cfg)   # one-time bf16 cast + layer stacking

    B = 2
    x = jax.random.normal(
        xkey, (B, cfg["in_channels"], cfg["img_size"], cfg["img_size"]),
        dtype=jnp.float32)  # NCHW, as in PyTorch

    logits = vit_forward(x, fast, cfg)
    logits = jax.block_until_ready(logits)
    assert logits.shape == (B, cfg["num_classes"] * cfg["num_outputs"]), logits.shape
    assert bool(jnp.all(jnp.isfinite(logits)))
    print("KERNEL_OK")
</pallas_src>

<mosaic_0001>
module attributes {stable_mosaic.version = 11 : i64} {
  func.func @_embed_kernel(%arg0: i32, %arg1: memref<2x17x64xbf16, #tpu.memory_space<vmem>>, %arg2: memref<64x32xbf16, #tpu.memory_space<vmem>>, %arg3: memref<1x32xf32, #tpu.memory_space<vmem>>, %arg4: memref<1x32xf32, #tpu.memory_space<vmem>>, %arg5: memref<17x32xf32, #tpu.memory_space<vmem>>, %arg6: memref<2x17x32xf32, #tpu.memory_space<vmem>>) attributes {dimension_semantics = [#tpu.dimension_semantics<parallel>], iteration_bounds = array<i64: 1>, scalar_prefetch = 0 : i64, scratch_operands = 0 : i64, tpu.core_type = #tpu.core_type<tc>, window_params = [{transform_indices = @transform_0, window_bounds = array<i64: 2, 17, 64>}, {pipeline_mode = #tpu.pipeline_mode<synchronous>, transform_indices = @transform_1, window_bounds = array<i64: 64, 32>}, {pipeline_mode = #tpu.pipeline_mode<synchronous>, transform_indices = @transform_2, window_bounds = array<i64: 1, 32>}, {pipeline_mode = #tpu.pipeline_mode<synchronous>, transform_indices = @transform_3, window_bounds = array<i64: 1, 32>}, {pipeline_mode = #tpu.pipeline_mode<synchronous>, transform_indices = @transform_4, window_bounds = array<i64: 17, 32>}, {transform_indices = @transform_5, window_bounds = array<i64: 2, 17, 32>}]} {
    %c0 = arith.constant 0 : index
    %c0_0 = arith.constant 0 : index
    %c0_1 = arith.constant 0 : index
    %0 = vector.load %arg1[%c0, %c0_0, %c0_1] : memref<2x17x64xbf16, #tpu.memory_space<vmem>>, vector<2x17x64xbf16>
    %1 = vector.shape_cast %0 : vector<2x17x64xbf16> to vector<34x64xbf16>
    %c0_2 = arith.constant 0 : index
    %c0_3 = arith.constant 0 : index
    %2 = vector.load %arg2[%c0_2, %c0_3] : memref<64x32xbf16, #tpu.memory_space<vmem>>, vector<64x32xbf16>
    %cst = arith.constant dense<0.000000e+00> : vector<34x32xf32>
    %3 = tpu.matmul %1, %2, %cst {dimension_numbers = #tpu.dot_dimension_numbers<[1], [0], [0], [1], [0, 0, 1, 1], [], []>} : vector<34x64xbf16>, vector<64x32xbf16>, vector<34x32xf32> -> vector<34x32xf32>
    %c0_4 = arith.constant 0 : index
    %c0_5 = arith.constant 0 : index
    %4 = vector.load %arg3[%c0_4, %c0_5] : memref<1x32xf32, #tpu.memory_space<vmem>>, vector<1x32xf32>
    %5 = vector.broadcast %4 : vector<1x32xf32> to vector<34x32xf32>
    %6 = arith.addf %3, %5 : vector<34x32xf32>
    %7 = vector.shape_cast %6 : vector<34x32xf32> to vector<2x17x32xf32>
    %c0_6 = arith.constant 0 : index
    %c0_7 = arith.constant 0 : index
    %8 = vector.load %arg5[%c0_6, %c0_7] : memref<17x32xf32, #tpu.memory_space<vmem>>, vector<17x32xf32>
    %9 = vector.shape_cast %8 : vector<17x32xf32> to vector<1x17x32xf32>
    %10 = vector.broadcast %9 : vector<1x17x32xf32> to vector<2x17x32xf32>
    %11 = arith.addf %7, %10 : vector<2x17x32xf32>
    %c0_8 = arith.constant 0 : index
    %c0_9 = arith.constant 0 : index
    %c0_10 = arith.constant 0 : index
    %12 = vector.load %arg6[%c0_8, %c0_9, %c0_10] : memref<2x17x32xf32, #tpu.memory_space<vmem>>, vector<2x17x32xf32>
    tpu.vector_store %arg6[%c0_8, %c0_9, %c0_10], %11 {strides = array<i32>} : memref<2x17x32xf32, #tpu.memory_space<vmem>>, vector<2x17x32xf32>,
    %c0_11 = arith.constant 0 : index
    %c0_12 = arith.constant 0 : index
    %13 = vector.load %arg4[%c0_11, %c0_12] : memref<1x32xf32, #tpu.memory_space<vmem>>, vector<1x32xf32>
    %c0_13 = arith.constant 0 : index
    %c0_14 = arith.constant 0 : index
    %14 = vector.load %arg5[%c0_13, %c0_14] : memref<17x32xf32, #tpu.memory_space<vmem>>, vector<1x32xf32>
    %15 = arith.addf %13, %14 : vector<1x32xf32>
    %c0_15 = arith.constant 0 : index
    %c0_16 = arith.constant 0 : index
    %c0_17 = arith.constant 0 : index
    %16 = vector.load %arg6[%c0_15, %c0_16, %c0_17] : memref<2x17x32xf32, #tpu.memory_space<vmem>>, vector<1x1x32xf32>
    %17 = vector.shape_cast %16 : vector<1x1x32xf32> to vector<1x32xf32>
    %18 = vector.shape_cast %15 : vector<1x32xf32> to vector<1x1x32xf32>
    tpu.vector_store %arg6[%c0_15, %c0_16, %c0_17], %18 {strides = array<i32>} : memref<2x17x32xf32, #tpu.memory_space<vmem>>, vector<1x1x32xf32>,
    %c1 = arith.constant 1 : index
    %c0_18 = arith.constant 0 : index
    %c0_19 = arith.constant 0 : index
    %19 = vector.load %arg6[%c1, %c0_18, %c0_19] : memref<2x17x32xf32, #tpu.memory_space<vmem>>, vector<1x1x32xf32>
    %20 = vector.shape_cast %19 : vector<1x1x32xf32> to vector<1x32xf32>
    %21 = vector.shape_cast %15 : vector<1x32xf32> to vector<1x1x32xf32>
    tpu.vector_store %arg6[%c1, %c0_18, %c0_19], %21 {strides = array<i32>} : memref<2x17x32xf32, #tpu.memory_space<vmem>>, vector<1x1x32xf32>,
    return
  }
  func.func @transform_0(%arg0: i32) -> (i32, i32, i32) {
    %c0_i32 = arith.constant 0 : i32
    %c0_i32_0 = arith.constant 0 : i32
    %c0_i32_1 = arith.constant 0 : i32
    return %arg0, %c0_i32, %c0_i32_0 : i32, i32, i32
  }
  func.func @transform_1(%arg0: i32) -> (i32, i32) {
    %c0_i32 = arith.constant 0 : i32
    %c0_i32_0 = arith.constant 0 : i32
    %c0_i32_1 = arith.constant 0 : i32
    return %c0_i32, %c0_i32_0 : i32, i32
  }
  func.func @transform_2(%arg0: i32) -> (i32, i32) {
    %c0_i32 = arith.constant 0 : i32
    %c0_i32_0 = arith.constant 0 : i32
    %c0_i32_1 = arith.constant 0 : i32
    return %c0_i32, %c0_i32_0 : i32, i32
  }
  func.func @transform_3(%arg0: i32) -> (i32, i32) {
    %c0_i32 = arith.constant 0 : i32
    %c0_i32_0 = arith.constant 0 : i32
    %c0_i32_1 = arith.constant 0 : i32
    return %c0_i32, %c0_i32_0 : i32, i32
  }
  func.func @transform_4(%arg0: i32) -> (i32, i32) {
    %c0_i32 = arith.constant 0 : i32
    %c0_i32_0 = arith.constant 0 : i32
    %c0_i32_1 = arith.constant 0 : i32
    return %c0_i32, %c0_i32_0 : i32, i32
  }
  func.func @transform_5(%arg0: i32) -> (i32, i32, i32) {
    %c0_i32 = arith.constant 0 : i32
    %c0_i32_0 = arith.constant 0 : i32
    %c0_i32_1 = arith.constant 0 : i32
    return %arg0, %c0_i32, %c0_i32_0 : i32, i32, i32
  }
}

</mosaic_0001>

<bundles_post_ra>
// kernel: tpu_custom_call.1
= control target key start
LH: loop header
LB: loop body
LE: loop exit
PB: predicated region body
PF: predicated region fallthrough
CT: control target
= control target key end

     0   :  { %v44_v0 = vlaneseq  ;;  %v1204_v1 = vmov 0.0   ;;  %v1205_v3 = vmov 1966171168   ;;  %vm1206_vm0 = vmmov 0   ;;  %s1558_s1 = inlined_call_operand.vmem [shape: bf16[64,32], index: 1, kind: input, shape index: {}]   ;;  %s1559_s0 = inlined_call_operand.vmem [shape: bf16[2,17,64], index: 0, kind: input, shape index: {}]   ;;  %s1560_s4 = inlined_call_operand.vmem [shape: f32[17,32], index: 4, kind: input, shape index: {}]   ;;  %s1561_s2 = inlined_call_operand.vmem [shape: f32[1,32], index: 2, kind: input, shape index: {}]   ;;  %s1562_s3 = inlined_call_operand.vmem [shape: f32[1,32], index: 3, kind: input, shape index: {}]   ;;  %s1563_s5 = inlined_call_operand.vmem [shape: f32[2,17,32], index: 5, kind: output, shape index: {}]  }
   0x1   :  { %1167 = vmatprep.subr.bf16.mxu0 %v1204_v1  ;;  %v1198_v2 = vld [vmem:[%s1558_s1] sm:$0xff]   ;;  %1187 = vmatprep.subr.bf16.mxu1 %v1204_v1  ;;  %v42_v4 = vunpack.c.l.s4 %v1205_v3  ;;  %v1199_v6 = vld [vmem:[%s1558_s1 + $0x8] sm:$0xff]   ;;  %v1200_v12 = vld [vmem:[%s1558_s1 + $0x10] sm:$0xff]   ;;  %vm359_vm1 = vcmask 523264   ;;  %vm1118_vm2 = vcmask 253952   ;;  %vm1115_vm3 = vcmask 261120  }
   0x2   :  { %1175 = vmatprep.mubr.msk.bf16.mxu0 %vm1206_vm0, %v1204_v1  ;;  %v45_v5 = vshrl.u32 %v44_v0, 7  ;;  %1179 = vmatprep.mubr.msk.bf16.mxu1 %vm1206_vm0, %v1204_v1  ;;  %v1133_v8 = vld.sshfl [vmem:[%s1559_s0] sm:$0x33 pattern:$0x75316420]  ;;  %v1201_v28 = vld [vmem:[%s1558_s1 + $0x18] sm:$0xff]  }
   0x3   :  { %1168 = vmatpush3.bf16.msra.mxu0 %v1198_v2  ;;  %1191 = vmatpush3.bf16.msra.mxu1 %v1198_v2  ;;  %v43_v7 = vunpack.c.0.s8 %v42_v4  ;;  %v1134_v10 = vld.sshfl [vmem:[%s1559_s0 + $0x4] sm:$0x33 pattern:$0x75316420]  ;;  %v40_v11 = vcombine.high %v1133_v8, %v1133_v8 }
   0x4   :  { %1169 = vmatprep.subr.bf16.mxu0 %v1204_v1  ;;  %1188 = vmatprep.subr.bf16.mxu1 %v1204_v1  ;;  %v64_v14 = vcombine.high %v1134_v10, %v1134_v10  ;;  %v1135_v16 = vld.sshfl [vmem:[%s1559_s0 + $0x8] sm:$0x1 pattern:$0x75316420] }
   0x5   :  { %v1254_v9 = vsub.s32 %v43_v7, %v45_v5  ;;  %v1136_v18 = vld.sshfl [vmem:[%s1559_s0 + $0xc] sm:$0x33 pattern:$0x75316420] }
   0x6   :  { %v1137_v20 = vld.sshfl [vmem:[%s1559_s0 + $0x10] sm:$0x33 pattern:$0x75316420]  ;;  %v102_v22 = vcombine.high %v1136_v18, %v1136_v18 }
   0x7   :  { %1170 = vmatpush3.bf16.msra.mxu0 %v1199_v6  ;;  %1192 = vmatpush3.bf16.msra.mxu1 %v1199_v6  ;;  %v47_v13 = vrot.slane %v1133_v8, %v1254_v9  ;;  %v71_v15 = vrot.slane %v1134_v10, %v1254_v9  ;;  %v54_v17 = vrot.slane %v40_v11, %v1254_v9  ;;  %v1138_v63 = vld.sshfl [vmem:[%s1559_s0 + $0x14] sm:$0x1 pattern:$0x75316420] }
   0x8   :  { %1171 = vmatprep.subr.bf16.mxu0 %v1204_v1  ;;  %1189 = vmatprep.subr.bf16.mxu1 %v1204_v1  ;;  %v78_v19 = vrot.slane %v64_v14, %v1254_v9  ;;  %v94_v21 = vrot.slane %v1135_v16, %v1254_v9  ;;  %v109_v23 = vrot.slane %v1136_v18, %v1254_v9  ;;  %v682_v18 = vld [vmem:[%s1560_s4] sm:$0xff] }
   0x9   :  { %v223_v24 = vcombine.low %v47_v13, %v54_v17  ;;  %v1149_v25 = vcombine.high %v47_v13, %v54_v17  ;;  %v126_v26 = vcombine.high %v1137_v20, %v1137_v20  ;;  %v133_v27 = vrot.slane %v1137_v20, %v1254_v9 }
   0xa   :  { %v225_v29 = vcombine.low %v71_v15, %v78_v19  ;;  %v1150_v30 = vcombine.high %v71_v15, %v78_v19  ;;  %v116_v31 = vrot.slane %v102_v22, %v1254_v9  ;;  %v175_v32 = vunpack.i.h.s16 %v109_v23  ;;  %v683_v19 = vld [vmem:[%s1560_s4 + $0x8] sm:$0xff] }
   0xb   :  { %1172 = vmatpush3.bf16.msra.mxu0 %v1200_v12  ;;  %1193 = vmatpush3.bf16.msra.mxu1 %v1200_v12  ;;  %v233_v33 = vrot.slane %v223_v24, %v1254_v9  ;;  %v240_v34 = vrot.slane %v1149_v25, %v1254_v9  ;;  %v117_v35 = vcombine.high %v109_v23, %v109_v23  ;;  %v183_v36 = vunpack.i.h.s16 %v133_v27  ;;  %v1322_v24 = vld [vmem:[%s1561_s2] ss:$0 sm:$0xff] }
   0xc   :  { %1173 = vmatprep.subr.bf16.mxu0 %v1204_v1  ;;  %1190 = vmatprep.subr.bf16.mxu1 %v1204_v1  ;;  %v247_v37 = vrot.slane %v225_v29, %v1254_v9  ;;  %v254_v38 = vrot.slane %v1150_v30, %v1254_v9  ;;  %v118_v39 = vcombine.high %v116_v31, %v116_v31  ;;  %v177_v43 = vunpack.i.h.s16 %v116_v31 }
   0xd   :  { %v140_v40 = vrot.slane %v126_v26, %v1254_v9  ;;  %v255_v41 = vcombine.low %v233_v33, %v240_v34  ;;  %v141_v42 = vcombine.high %v133_v27, %v133_v27  ;;  %v179_v44 = vunpack.i.h.s16 %v117_v35 }
   0xe   :  { %v256_v45 = vcombine.low %v247_v37, %v254_v38  ;;  %v181_v47 = vunpack.i.h.s16 %v118_v39  ;;  %v1140_v51 = vpack.i.b16 %v109_v23, %v94_v21  ;;  %v1141_v52 = vpack.i.b16 %v116_v31, %v175_v32 }
   0xf   :  { %1174 = vmatpush3.bf16.msra.mxu0 %v1201_v28  ;;  %1194 = vmatpush3.bf16.msra.mxu1 %v1201_v28  ;;  %v142_v46 = vcombine.high %v140_v40, %v140_v40  ;;  %v185_v48 = vunpack.i.h.s16 %v140_v40  ;;  %v263_v49 = vrot.slane %v255_v41, %v1254_v9  ;;  %v187_v50 = vunpack.i.h.s16 %v141_v42 }
  0x10   :  { %v270_v53 = vrot.slane %v256_v45, %v1254_v9  ;;  %v1142_v54 = vpack.i.b16 %v117_v35, %v177_v43  ;;  %v1143_v55 = vpack.i.b16 %v118_v39, %v179_v44  ;;  %v1144_v56 = vpack.i.b16 %v133_v27, %v181_v47 }
  0x11   :  { %v1145_v57 = vpack.i.b16 %v140_v40, %v183_v36  ;;  %v1146_v58 = vpack.i.b16 %v141_v42, %v185_v48  ;;  %v1147_v59 = vpack.i.b16 %v142_v46, %v187_v50  ;;  %v272_v60 = vcombine.low %v1140_v51, %v1141_v52 }
  0x12   :  { %v271_v61 = vcombine.low %v263_v49, %v270_v53  ;;  %v273_v62 = vcombine.low %v1142_v54, %v1143_v55  ;;  %v156_v7 = vrot.slane %v1138_v63, %v1254_v9  ;;  %v189_v8 = vunpack.i.h.s16 %v142_v46 }
  0x13   :  { %v274_v0 = vcombine.low %v1144_v56, %v1145_v57  ;;  %v275_v2 = vcombine.low %v1146_v58, %v1147_v59  ;;  %v282_v3 = vrot.slane %v272_v60, %v1254_v9  ;;  %v688_v20 = vcombine.high %v682_v18, %v682_v18 }
  0x14   :  { %1176 = vmatmul.mubr.msk.bf16.vlgmr.msra.gmra.mrb[0].mxu0 %vm359_vm1, %v271_v61  ;;  %v289_v4 = vrot.slane %v273_v62, %v1254_v9  ;;  %v1148_v14 = vpack.i.b16 %v156_v7, %v189_v8  ;;  %v695_v21 = vrot.slane %v682_v18, %v1254_v9  ;;  %v737_v22 = vcombine.high %v683_v19, %v683_v19 }
  0x15   :  { %v296_v5 = vrot.slane %v274_v0, %v1254_v9  ;;  %v303_v6 = vrot.slane %v275_v2, %v1254_v9  ;;  %v702_v23 = vrot.slane %v688_v20, %v1254_v9 }
  0x16   :  { %v304_v10 = vcombine.low %v282_v3, %v289_v4  ;;  %v327_v16 = vrot.slane %v1148_v14, %v1254_v9  ;;  %v703_v25 = vcombine.high %v695_v21, %v695_v21  ;;  %v751_v26 = vrot.slane %v737_v22, %v1254_v9  ;;  %v1123_v3 = vld [vmem:[%s1562_s3] sm:$0x1] }
  0x17   :  { %v305_v11 = vcombine.low %v296_v5, %v303_v6  ;;  %v704_v28 = vcombine.high %v702_v23, %v702_v23  ;;  %v1326_v29 = vrot.slane %v695_v21, %v1254_v9  ;;  %v1329_v30 = vrot.slane %v702_v23, %v1254_v9  ;;  %v1124_v4 = vld [vmem:[%s1560_s4] sm:$0x1]  ;;  %v1158_v21 = vld.sshfl [vmem:[%s1560_s4 + $0x10] sm:$0x1 pattern:$0x75316420] }
  0x18   :  { %v312_v12 = vrot.slane %v304_v10, %v1254_v9  ;;  %v334_v17 = vrot.slane %v327_v16, %v1254_v9  ;;  %v1333_v34 = vrot.slane %v703_v25, %v1254_v9  ;;  %v753_v36 = vcombine.high %v751_v26, %v751_v26 }
  0x19   :  { %v319_v13 = vrot.slane %v305_v11, %v1254_v9  ;;  %v1341_v42 = vrot.slane %v704_v28, %v1254_v9  ;;  %v1345_v43 = vcombine.high %v1326_v29, %v1326_v29  ;;  %v1349_v44 = vcombine.high %v1329_v30, %v1329_v30 }
  0x1a   :  { %v1358_v50 = vcombine.high %v1333_v34, %v1333_v34  ;;  %v1362_v52 = vrot.slane %v751_v26, %v1254_v9  ;;  %v1365_v53 = vrot.slane %v753_v36, %v1254_v9  ;;  %v1397_v18 = vadd.f32 %v1124_v4, %v1123_v3 }
  0x1b   :  { %v320_v15 = vcombine.low %v312_v12, %v319_v13  ;;  %v1408_v26 = vcombine.high %v1341_v42, %v1341_v42  ;;  %v1413_v36 = vrot.slane %v1158_v21, %v1254_v9 }
  0x1c   :  { %v1387_v8 = vcombine.high %v1362_v52, %v1362_v52 }
  0x1d   :  { %1180 = vmatmul.mubr.msk.bf16.vlgmr.msra.gmra.mrb[0].mxu1 %vm359_vm1, %v320_v15 }
  0x1e   :  { %1183 = vmatprep.mubr.msk.bf16.mxu1 %vm1206_vm0, %v1204_v1  ;;  %v744_v1 = vrot.slane %v683_v19, %v1254_v9 }
  0x20   :  { %v752_v31 = vcombine.high %v744_v1, %v744_v1  ;;  %v1338_v40 = vrot.slane %v744_v1, %v1254_v9 }
  0x22   :  { %v1352_v45 = vrot.slane %v752_v31, %v1254_v9  ;;  %v1370_v57 = vcombine.high %v1338_v40, %v1338_v40 }
  0x24   :  { %v1391_v10 = vcombine.high %v1352_v45, %v1352_v45 }
  0x25   :  { %1184 = vmatmul.mubr.msk.bf16.gmra.mrb[4].mxu1 %vm359_vm1, %v334_v17 }
  0xe7   :  { %v403_v27 = vpop.f32.mrb[0].mxu0 }
  0xe8   :  { %v404_v32 = vadd.f32 %v1322_v24, %v403_v27  ;;  %v1177_v33 = vpop.f32.mrb[1].mxu0 }
  0xe9   :  { %v406_v35 = vpop.f32.mrb[2].mxu0 }
  0xea   :  { %v430_v37 = vcombine.high %v404_v32, %v404_v32  ;;  %v437_v38 = vrot.slane %v404_v32, %v1254_v9  ;;  %v407_v39 = vadd.f32 %v1322_v24, %v406_v35  ;;  %v1178_v41 = vpop.f32.mrb[3].mxu0 }
  0xec   :  { %v444_v46 = vrot.slane %v430_v37, %v1254_v9  ;;  %v445_v47 = vcombine.high %v437_v38, %v437_v38  ;;  %v453_v48 = vrot.slane %v437_v38, %v1254_v9  ;;  %v479_v49 = vcombine.high %v407_v39, %v407_v39 }
  0xed   :  { %v486_v51 = vrot.slane %v407_v39, %v1254_v9  ;;  %v1417_v37 = vcombine.high %v1365_v53, %v1365_v53 }
  0xee   :  { %v446_v54 = vcombine.high %v444_v46, %v444_v46  ;;  %v467_v55 = vrot.slane %v445_v47, %v1254_v9  ;;  %v475_v56 = vcombine.high %v453_v48, %v453_v48  ;;  %v817_v58 = vadd.f32 %v1326_v29, %v453_v48 }
  0xef   :  { %v493_v59 = vrot.slane %v479_v49, %v1254_v9  ;;  %v494_v60 = vcombine.high %v486_v51, %v486_v51  ;;  %v502_v61 = vrot.slane %v486_v51, %v1254_v9  ;;  %v460_v62 = vrot.slane %v444_v46, %v1254_v9 }
  0xf0   :  { %v474_v63 = vrot.slane %v446_v54, %v1254_v9  ;;  %v477_v0 = vcombine.high %v467_v55, %v467_v55  ;;  %v818_v2 = vadd.f32 %v1333_v34, %v467_v55  ;;  %v411_v5 = vpop.f32.mrb[0].mxu1  ;;  %v819_v6 = vadd.f32 %v1345_v43, %v475_v56 }
  0xf1   :  { %v495_v7 = vcombine.high %v493_v59, %v493_v59  ;;  %v1181_v11 = vpop.f32.mrb[1].mxu1  ;;  %v821_v13 = vadd.f32 %v1329_v30, %v460_v62  ;;  %v509_v15 = vrot.slane %v493_v59, %v1254_v9  ;;  %v516_v19 = vrot.slane %v494_v60, %v1254_v9 }
  0xf2   :  { %v820_v12 = vadd.f32 %v1358_v50, %v477_v0  ;;  %v822_v14 = vadd.f32 %v1341_v42, %v474_v63  ;;  %v414_v16 = vpop.f32.mrb[2].mxu1  ;;  %v885_v17 = vcombine.low %v817_v58, %v818_v2  ;;  %v524_v20 = vcombine.high %v502_v61, %v502_v61 }
  0xf3   :  { %v1182_v22 = vpop.f32.mrb[3].mxu1  ;;  %v476_v23 = vcombine.high %v460_v62, %v460_v62  ;;  %v1404_v25 = vrot.slane %v495_v7, %v1254_v9  ;;  %v478_v27 = vcombine.high %v474_v63, %v474_v63  ;;  %v526_v28 = vcombine.high %v516_v19, %v516_v19 }
  0xf4   :  { %v886_v1 = vcombine.low %v819_v6, %v820_v12  ;;  %v825_v31 = vadd.f32 %v1338_v40, %v502_v61  ;;  %v826_v32 = vadd.f32 %v1352_v45, %v516_v19  ;;  %v887_v33 = vcombine.low %v821_v13, %v822_v14 }
  0xf5   :  { %v525_v35 = vcombine.high %v509_v15, %v509_v15  ;;  %v1420_v38 = vrot.slane %v885_v17, %v1254_v9  ;;  %v1426_v41 = vadd.f32 %v1370_v57, %v524_v20  ;;  %v828_v46 = vadd.f32 %v1391_v10, %v526_v28 }
  0xf6   :  { %v1423_v39 = vrot.slane %v886_v1, %v1254_v9  ;;  %v823_v47 = vadd.f32 %v1349_v44, %v476_v23  ;;  %v527_v48 = vcombine.high %v1404_v25, %v1404_v25  ;;  %v412_v49 = vadd.f32 %v1322_v24, %v411_v5 }
  0xf7   :  { %v415_v51 = vadd.f32 %v1322_v24, %v414_v16  ;;  %v1435_v55 = vadd.f32 %v1362_v52, %v509_v15  ;;  %v1439_v56 = vadd.f32 %v1365_v53, %v1404_v25  ;;  %v934_v58 = vcombine.low %v825_v31, %v826_v32 }
  0xf8   :  { %v419_v54 = vpop.f32.mrb[4].mxu1  ;;  %v824_v59 = vadd.f32 %v1408_v26, %v478_v27  ;;  %v1443_v61 = vrot.slane %v887_v33, %v1254_v9  ;;  %v528_v62 = vcombine.high %v412_v49, %v412_v49  ;;  %v535_v63 = vrot.slane %v412_v49, %v1254_v9 }
  0xf9   :  { %v1185_v60 = vpop.f32.mrb[5].mxu1  ;;  %v577_v0 = vcombine.high %v415_v51, %v415_v51  ;;  %v917_v3 = vcombine.low %v1420_v38, %v1423_v39  ;;  %v1449_v4 = vadd.f32 %v1387_v8, %v525_v35  ;;  %v935_v5 = vcombine.low %v1426_v41, %v828_v46 }
  0xfa   :  { %v422_v2 = vpop.f32.mrb[6].mxu1  ;;  %v584_v6 = vrot.slane %v415_v51, %v1254_v9  ;;  %v542_v11 = vrot.slane %v528_v62, %v1254_v9  ;;  %v543_v12 = vcombine.high %v535_v63, %v535_v63  ;;  %v551_v13 = vrot.slane %v535_v63, %v1254_v9 }
  0xfb   :  { %v1186_v7 = vpop.f32.mrb[7].mxu1  ;;  %v591_v14 = vrot.slane %v577_v0, %v1254_v9  ;;  %v936_v15 = vcombine.low %v1435_v55, %v1439_v56  ;;  %v1459_v16 = vrot.slane %v934_v58, %v1254_v9  ;;  %v888_v19 = vcombine.low %v823_v47, %v824_v59 }
  0xfc   :  { %v592_v17 = vcombine.high %v584_v6, %v584_v6  ;;  %v544_v20 = vcombine.high %v542_v11, %v542_v11  ;;  %v558_v21 = vrot.slane %v542_v11, %v1254_v9  ;;  %v565_v22 = vrot.slane %v543_v12, %v1254_v9 }
  0xfd   :  { %v573_v23 = vcombine.high %v551_v13, %v551_v13  ;;  %v833_v1 = vadd.f32 %v1413_v36, %v551_v13  ;;  %v593_v27 = vcombine.high %v591_v14, %v591_v14  ;;  %v600_v28 = vrot.slane %v584_v6, %v1254_v9 }
  0xfe   :  { %v607_v31 = vrot.slane %v591_v14, %v1254_v9  ;;  %v572_v32 = vrot.slane %v544_v20, %v1254_v9  ;;  %v574_v33 = vcombine.high %v558_v21, %v558_v21  ;;  %v575_v35 = vcombine.high %v565_v22, %v565_v22 }
  0xff   :  { %v834_v38 = vadd.f32 %v1326_v29, %v565_v22  ;;  %v835_v39 = vadd.f32 %v1333_v34, %v573_v23  ;;  %v837_v41 = vadd.f32 %v1358_v50, %v558_v21  ;;  %v989_v46 = vrot.slane %v833_v1, %v1254_v9 }
 0x100   :  { %v614_v47 = vrot.slane %v592_v17, %v1254_v9  ;;  %v576_v49 = vcombine.high %v572_v32, %v572_v32  ;;  %v836_v51 = vadd.f32 %v1345_v43, %v575_v35  ;;  %v838_v58 = vadd.f32 %v1329_v30, %v572_v32 }
 0x101   :  { %v839_v59 = vadd.f32 %v1341_v42, %v574_v33  ;;  %v996_v60 = vrot.slane %v989_v46, %v1254_v9  ;;  %v622_v62 = vcombine.high %v600_v28, %v600_v28  ;;  %v916_v29 = vrot.slane %v888_v19, %v1254_v9 }
 0x102   :  { %v420_v34 = vadd.f32 %v1322_v24, %v419_v54  ;;  %v997_v50 = vcombine.low %v834_v38, %v835_v39  ;;  %v998_v63 = vcombine.low %v836_v51, %v837_v41  ;;  %v621_v0 = vrot.slane %v593_v27, %v1254_v9 }
 0x103   :  { %v624_v2 = vcombine.high %v614_v47, %v614_v47  ;;  %v925_v6 = vrot.slane %v917_v3, %v1254_v9  ;;  %v951_v43 = vrot.slane %v935_v5, %v1254_v9  ;;  %1119 = vst.msk [vmem:[%s1563_s5 + $0x10] sm:$0x1] %vm1118_vm2, %v996_v60  ;;  %v623_v30 = vcombine.high %v607_v31, %v607_v31 }
 0x104   :  { %v840_v42 = vadd.f32 %v1349_v44, %v576_v49  ;;  %v999_v7 = vcombine.low %v838_v58, %v839_v59  ;;  %v1014_v24 = vrot.slane %v998_v63, %v1254_v9  ;;  %v841_v54 = vadd.f32 %v1408_v26, %v600_v28 }
 0x105   :  { %v844_v11 = vadd.f32 %v1370_v57, %v624_v2  ;;  %v842_v12 = vadd.f32 %v1338_v40, %v614_v47  ;;  %v843_v3 = vadd.f32 %v1352_v45, %v622_v62  ;;  %v845_v5 = vadd.f32 %v1391_v10, %v607_v31 }
 0x106   :  { %v918_v13 = vcombine.low %v1443_v61, %v916_v29  ;;  %v1007_v14 = vrot.slane %v997_v50, %v1254_v9  ;;  %v625_v17 = vcombine.high %v621_v0, %v621_v0  ;;  %v846_v44 = vadd.f32 %v1362_v52, %v621_v0 }
 0x107   :  { %v1000_v19 = vcombine.low %v840_v42, %v841_v54  ;;  %v847_v20 = vadd.f32 %v1365_v53, %v623_v30  ;;  %v1047_v21 = vcombine.low %v844_v11, %v845_v5  ;;  %v632_v57 = vrot.slane %v420_v34, %v1254_v9 }
 0x108   :  { %v932_v26 = vrot.slane %v918_v13, %v1254_v9  ;;  %v1029_v40 = vcombine.low %v1007_v14, %v1014_v24  ;;  %v1021_v45 = vrot.slane %v999_v7, %v1254_v9  ;;  %v832_v61 = vadd.f32 %v1417_v37, %v527_v48 }
 0x109   :  { %v1028_v10 = vrot.slane %v1000_v19, %v1254_v9  ;;  %v1046_v52 = vcombine.low %v842_v12, %v843_v3  ;;  %v633_v23 = vcombine.high %v632_v57, %v632_v57  ;;  %v640_v53 = vrot.slane %v632_v57, %v1254_v9 }
 0x10a   :  { %v933_v22 = vcombine.low %v925_v6, %v932_v26  ;;  %v958_v1 = vrot.slane %v936_v15, %v1254_v9  ;;  %v848_v28 = vadd.f32 %v1387_v8, %v625_v17  ;;  %v937_v31 = vcombine.low %v1449_v4, %v832_v61 }
 0x10b   :  { %v1030_v27 = vcombine.low %v1021_v45, %v1028_v10  ;;  %v1048_v32 = vcombine.low %v846_v44, %v847_v20  ;;  %v1063_v25 = vrot.slane %v1047_v21, %v1254_v9  ;;  %v647_v48 = vrot.slane %v633_v23, %v1254_v9 }
 0x10c   :  { %1116 = vst.msk [vmem:[%s1563_s5] sm:$0xff] %vm1115_vm3, %v933_v22  ;;  %v849_v33 = vadd.f32 %v1417_v37, %v640_v53  ;;  %v966_v55 = vcombine.low %v1459_v16, %v951_v43  ;;  %v1037_v56 = vrot.slane %v1029_v40, %v1254_v9  ;;  %v965_v4 = vrot.slane %v937_v31, %v1254_v9 }
 0x10d   :  { %v1044_v8 = vrot.slane %v1030_v27, %v1254_v9  ;;  %1126 = vst.msk [vmem:[%s1563_s5] sm:$0x1] %vm1118_vm2, %v1397_v18  ;;  %v1056_v15 = vrot.slane %v1046_v52, %v1254_v9  ;;  %v850_v35 = vadd.f32 %v1413_v36, %v647_v48  ;;  %v1070_v41 = vrot.slane %v1048_v32, %v1254_v9 }
 0x10e   :  { %v1049_v38 = vcombine.low %v848_v28, %v849_v33  ;;  %v967_v39 = vcombine.low %v958_v1, %v965_v4  ;;  %v974_v49 = vrot.slane %v966_v55, %v1254_v9 }
 0x10f   :  { %v1045_v37 = vcombine.low %v1037_v56, %v1044_v8  ;;  %v1078_v16 = vcombine.low %v1056_v15, %v1063_v25  ;;  %v1101_v47 = vrot.slane %v850_v35, %v1254_v9 }
 0x110   :  { %v1077_v46 = vrot.slane %v1049_v38, %v1254_v9  ;;  %v981_v51 = vrot.slane %v967_v39, %v1254_v9 }
 0x111   :  { %1120 = vst.msk [vmem:[%s1563_s5 + $0x18] sm:$0xff] %vm1115_vm3, %v1045_v37  ;;  %v1108_v58 = vrot.slane %v1101_v47, %v1254_v9  ;;  %v1086_v60 = vrot.slane %v1078_v16, %v1254_v9 }
 0x112   :  { %1159 = vst.msk [vmem:[%s1563_s5 + $0x18] sm:$0x1] %vm1118_vm2, %v1397_v18  ;;  %v1079_v36 = vcombine.low %v1070_v41, %v1077_v46  ;;  %v982_v59 = vcombine.low %v974_v49, %v981_v51 }
 0x113   :  { %1122 = vst.msk [vmem:[%s1563_s5 + $0x28] sm:$0x1] %vm1118_vm2, %v1108_v58 }
 0x114   :  { %v1093_v62 = vrot.slane %v1079_v36, %v1254_v9  ;;  %1117 = vst.msk [vmem:[%s1563_s5 + $0x8] sm:$0xff] %vm1115_vm3, %v982_v59 }
 0x116   :  { %v1094_v29 = vcombine.low %v1086_v60, %v1093_v62 }
 0x118   :  { %1121 = vst.msk [vmem:[%s1563_s5 + $0x20] sm:$0xff] %vm1115_vm3, %v1094_v29 }

</bundles_post_ra>
